<compile_context>
chip_gen: v7x
topology: tpu7x:2x2x1
jax: 0.10.0
libtpu: 0.0.40
codegen_flags: <defaults>
</compile_context>

<pallas_src>
import jax
import jax.numpy as jnp
from jax.experimental import pallas as pl
from jax.experimental.pallas import tpu as pltpu


def _relu_kernel(x_ref, o_ref):
    # Elementwise max(x, 0) on the current VMEM tile (VPU work, DMA-bound overall).
    o_ref[...] = jnp.maximum(x_ref[...], 0)


def _vmem_capacity_bytes() -> int:
    # v5e/v6e: 128 MiB VMEM per TensorCore; v7x: 64 MiB per TensorCore.
    try:
        return int(pltpu.get_tpu_info().vmem_capacity_bytes)
    except Exception:
        pass
    try:
        kind = jax.devices()[0].device_kind.lower()
        if "v5" in kind or "v6" in kind:
            return 128 << 20
        if "7" in kind:
            return 64 << 20
    except Exception:
        pass
    return 64 << 20  # conservative default (v7x per-TensorCore)


def relu_pallas(x: jax.Array) -> jax.Array:
    """ReLU(x) = max(x, 0), elementwise. Works for any shape / dtype."""
    orig_shape = x.shape
    dtype = x.dtype
    n = x.size
    if n == 0:
        return x
    itemsize = jnp.dtype(dtype).itemsize

    # --- 0) Tiny-tensor fast path: launch overhead dominates, and XLA can fuse
    #        the max into the producing op (zero extra HBM round trips). -------
    if n * itemsize < (1 << 20):
        return jnp.maximum(x, 0)

    # --- 1) Pick the widest lane-dense slab width that exactly divides n. -----
    width = 0
    for w in (4096, 2048, 1024, 512, 256, 128):
        if n % w == 0 and n >= w * 8:
            width = w
            break
    if width == 0:
        # Truly ragged size (n % 128 != 0): a pad/slice or prefix+concat path
        # would add full-array HBM passes; plain fused maximum is strictly better.
        return jnp.maximum(x, 0)

    rows = n // width

    # --- 2) Block rows: dtype-aware sublane packing multiple, block bytes sized
    #        per generation so 4x block (double-buffered in+out) fits VMEM. ----
    sublane = max(8, 32 // itemsize)          # 8 f32, 16 bf16, 32 int8/fp8
    vmem = _vmem_capacity_bytes()
    is_two_core = vmem <= (64 << 20)          # v7x: 2 TensorCores, 64 MiB VMEM each
    block_bytes_target = vmem // 16 if is_two_core else vmem // 8   # ~4 MiB / ~16 MiB
    tile_rows = max(sublane,
                    (block_bytes_target // (width * itemsize)) // sublane * sublane)
    if rows <= tile_rows:
        tile_rows = pl.cdiv(rows, sublane) * sublane      # whole array in one block
    if is_two_core and rows > sublane:
        # Ensure >= 2 grid steps so ("parallel",) actually splits across both TCs.
        half_rows = pl.cdiv(pl.cdiv(rows, 2), sublane) * sublane
        tile_rows = min(tile_rows, half_rows)

    # --- 3) No padding: cdiv grid over the unpadded slab; Pallas masks the
    #        partial final block (safe for an elementwise op). ------------------
    slab = jnp.ravel(x).reshape(rows, width)
    grid = (pl.cdiv(rows, tile_rows),)

    out = pl.pallas_call(
        _relu_kernel,
        out_shape=jax.ShapeDtypeStruct((rows, width), dtype),
        grid_spec=pltpu.PrefetchScalarGridSpec(
            num_scalar_prefetch=0,
            grid=grid,
            in_specs=[pl.BlockSpec((tile_rows, width), lambda i: (i, 0))],
            out_specs=pl.BlockSpec((tile_rows, width), lambda i: (i, 0)),
        ),
        compiler_params=pltpu.CompilerParams(
            # "parallel" lets the grid shard across v7x's 2 TensorCores
            # (no-op on single-TC v5e/v6e).
            dimension_semantics=("parallel",),
            vmem_limit_bytes=int(min(vmem * 3 // 4, 96 << 20)),
        ),
    )(slab)

    return out.reshape(orig_shape)


if __name__ == "__main__":
    key = jax.random.PRNGKey(0)

    # 1) Small NCHW input matching a typical PyTorch conv activation shape
    #    (takes the fused jnp.maximum fast path).
    x = jax.random.normal(key, (2, 4, 16, 16), dtype=jnp.float32)
    y = relu_pallas(x)
    jax.block_until_ready(y)
    assert y.shape == x.shape and y.dtype == x.dtype
    assert jnp.allclose(y, jnp.maximum(x, 0.0)), "mismatch (small fast path)"

    # 2) Moderate bf16 activation slab: exercises the Pallas kernel and the
    #    bf16 sublane-packing (tile_rows multiple of 16).
    x2 = jax.random.normal(jax.random.PRNGKey(1), (2, 4, 128, 1024),
                           dtype=jnp.bfloat16)
    y2 = relu_pallas(x2)
    jax.block_until_ready(y2)
    assert y2.shape == x2.shape and y2.dtype == x2.dtype
    assert jnp.array_equal(y2, jnp.maximum(x2, 0)), "mismatch (bf16 Pallas path)"

    # 3) Lane-aligned but not block-aligned f32 input: exercises the masked
    #    partial final block (no padding, no tail slice).
    x3 = jax.random.normal(jax.random.PRNGKey(2), (3, 7, 128, 128),
                           dtype=jnp.float32)
    y3 = relu_pallas(x3)
    jax.block_until_ready(y3)
    assert jnp.allclose(y3, jnp.maximum(x3, 0.0)), "mismatch (partial block path)"

    # 4) Ragged shape: falls back to the fused elementwise path.
    x4 = jax.random.normal(jax.random.PRNGKey(3), (3, 5, 7), dtype=jnp.float32)
    y4 = relu_pallas(x4)
    jax.block_until_ready(y4)
    assert jnp.allclose(y4, jnp.maximum(x4, 0.0)), "mismatch (ragged fallback)"

    print("KERNEL_OK")
</pallas_src>

<mosaic_0001>
module attributes {stable_mosaic.version = 11 : i64} {
  func.func @_relu_kernel(%arg0: i32, %arg1: memref<128x4096xbf16, #tpu.memory_space<vmem>>, %arg2: memref<128x4096xbf16, #tpu.memory_space<vmem>>) attributes {dimension_semantics = [#tpu.dimension_semantics<parallel>], iteration_bounds = array<i64: 2>, scalar_prefetch = 0 : i64, scratch_operands = 0 : i64, tpu.core_type = #tpu.core_type<tc>, window_params = [{transform_indices = @transform_0, window_bounds = array<i64: 128, 4096>}, {transform_indices = @transform_1, window_bounds = array<i64: 128, 4096>}]} {
    %c0 = arith.constant 0 : index
    %c0_0 = arith.constant 0 : index
    %0 = vector.load %arg1[%c0, %c0_0] : memref<128x4096xbf16, #tpu.memory_space<vmem>>, vector<128x4096xbf16>
    %cst = arith.constant 0.000000e+00 : bf16
    %1 = vector.broadcast %cst : bf16 to vector<128x4096xbf16>
    %2 = arith.maximumf %0, %1 : vector<128x4096xbf16>
    %c0_1 = arith.constant 0 : index
    %c0_2 = arith.constant 0 : index
    %3 = vector.load %arg2[%c0_1, %c0_2] : memref<128x4096xbf16, #tpu.memory_space<vmem>>, vector<128x4096xbf16>
    tpu.vector_store %arg2[%c0_1, %c0_2], %2 {strides = array<i32>} : memref<128x4096xbf16, #tpu.memory_space<vmem>>, vector<128x4096xbf16>,
    return
  }
  func.func @transform_0(%arg0: i32) -> (i32, i32) {
    %c0_i32 = arith.constant 0 : i32
    %c0_i32_0 = arith.constant 0 : i32
    return %arg0, %c0_i32 : i32, i32
  }
  func.func @transform_1(%arg0: i32) -> (i32, i32) {
    %c0_i32 = arith.constant 0 : i32
    %c0_i32_0 = arith.constant 0 : i32
    return %arg0, %c0_i32 : i32, i32
  }
}

</mosaic_0001>

<bundles_post_ra>
// kernel: tpu_custom_call.1
= control target key start
LH: loop header
LB: loop body
LE: loop exit
PB: predicated region body
PF: predicated region fallthrough
CT: control target
= control target key end

     0   :  { %6 = vsyncpa [#allocation3], 0  ;;  %s2116_s0 = inlined_call_operand.hbm [shape: bf16[256,4096], index: 0, kind: input, shape index: {}]   ;;  %s2117_s1 = inlined_call_operand.hbm [shape: bf16[256,4096], index: 1, kind: output, shape index: {}]  }
   0x1   :  { %8 = vsyncpa [#allocation3 + $0x1], 0 }
   0x2   :  { %9 = vsyncpa [#allocation4], 0 }
   0x3   :  { %11 = vsyncpa [#allocation4 + $0x1], 0  ;;  %s1181_s6 = smov 0   ;;  %s1183_s7 = smov 0  }
   0x4   :  { %s1185_s8 = smov 0   ;;  %s1187_s9 = smov 0  }
   0x5 LB: > { %s1202_s10 = sadd.s32 4294967295, %s1162_s9   ;;  %s995_s11 = sadd.s32 4294967294, %s1162_s9   ;;  %s1162_s9 = sphi %s1187_s9, %s2130_s9   ;;  %s1158_s8 = sphi %s1185_s8, %s2129_s8   ;;  %s1154_s7 = sphi %s1183_s7, %s2128_s7   ;;  %s1150_s6 = sphi %s1181_s6, %s2127_s6  }
   0x6   : > { %s1206_s12 = sadd.s32 1, %s1162_s9   ;;  %s24_s13 = sadd.s32 1, %s1158_s8 }
   0x7   : > { %s21_s14 = ssub.s32 %s1162_s9, %s1206_s12  ;;  %p31_p0 = scmp.ne.s32.totalorder %s1158_s8, %s1154_s7 }
   0x8   : > { %p22_p1 = scmp.eq.s32.totalorder %s21_s14, 0  ;;  %p32_p2 = scmp.eq.s32.totalorder %s1162_s9, 0 }
   0x9   : > { %p37_p3 = scmp.ne.s32.totalorder %s1154_s7, %s1150_s6  ;;  %p38_p4 = scmp.eq.s32.totalorder %s1202_s10, 0 }
   0xa   : > { %s1218_s15 = scalar_select %p22_p1, %s1158_s8, %s24_s13  }
   0xb   : > { %p1220_p5 = por %p32_p2, %p31_p0  ;;  %p1224_p6 = por %p38_p4, %p37_p3 }
   0xc   : > { %p61_p7 = scmp.eq.s32.totalorder %s1202_s10, 1  ;;  %p67_p8 = scmp.eq.s32.totalorder %s995_s11, 1 }
   0xd   : > { %p1027_p10 = scmp.lt.s32.totalorder %s1162_s9, 2  ;;  %s87_s20 = sand.u32 1, %s1158_s8  }
   0xe   : > { %p1231_p11 = por %p61_p7, %p31_p0  ;;  %p1235_p12 = por %p67_p8, %p37_p3 }
   0xf   : > { %s1012_s21 = sshll.u32 %s1162_s9, 15  ;;  %s998_s22 = sshll.u32 %s87_s20, 11 }
  0x10   : > { %s2121_s18 = scalar_select %p1231_p11, 1, 0 }
  0x11   : > { %s2122_s19 = scalar_select %p1235_p12, 1, 0 }
  0x12   : > { %s1244_s25 = scalar_lea.hbm %s2116_s0, %s1012_s21  ;;  %s91_s26 = scalar_lea.vmem [#allocation2], %s998_s22 }
  0x13   : > { %s99_s27 = sshll.u32 %s91_s26, 4  ;;  %p1248_p13 = pnand %p1027_p10, %p1220_p5  ;;  %s1252_s27 = int_to_ptr.vmem [resolvable:$true] %s99_s27 }
  0x14   : > { %s1254_s29 = scalar_lea.sflag [#allocation3], %s87_s20  ;;  %s1066_s30 = scalar_lea.hbm %s1244_s25, 32768 }
  0x15   : > { %p1067_p0 = scmp.ne.s32.totalorder %s1244_s25, %s1066_s30  ;;  %p1068_p1 = pneg %p1248_p13 }
  0x16   : > { %s1071_s4 = scalar_lea.hbm %s2116_s0, 65536  ;;  %p1072_p4 = scmp.lt.u32.totalorder %s1244_s25, %s2116_s0 }
  0x17   : > { %p1069_p2 = pnand %p1068_p1, %p1067_p0  ;;  %p1073_p5 = scmp.lt.u32.totalorder %s1071_s4, %s1066_s30 }
  0x18   : > { %p1075_p8 = scmp.lt.u32.totalorder %s1066_s30, %s1244_s25 }
  0x19   : > { %p1070_p3 = pneg %p1069_p2  ;;  %p1074_p7 = por %p1073_p5, %p1072_p4 }
  0x1b   : > { %p1076_p10 = por %p1075_p8, %p1074_p7 }
  0x1d   : > { %p1077_p9 = pnand %p1076_p10, %p1070_p3 }
  0x1f   : > { %1080 = shalt.err (!%p1077_p9)
}
  0x20   : > { %s1081_s13 = scalar_lea.vmem %s1252_s27, 32768  ;;  %s1164_s14 = smov [#allocation2]  }
  0x21   : > { %p1082_p0 = scmp.ne.s32.totalorder %s1252_s27, %s1081_s13  ;;  %s1086_s16 = sshll.u32 %s1164_s14, 4  ;;  %s1087_s16 = int_to_ptr.vmem [resolvable:$false] %s1086_s16 }
  0x22   : > { %s1088_s20 = scalar_lea.vmem %s1087_s16, 65536  ;;  %p1089_p11 = scmp.lt.s32.totalorder %s1252_s27, %s1087_s16 }
  0x23   : > { %p1084_p2 = pnand %p1082_p0, %p1068_p1  ;;  %p1090_p4 = scmp.lt.s32.totalorder %s1088_s20, %s1081_s13 }
  0x25   : > { %p1085_p12 = pneg %p1084_p2  ;;  %p1091_p5 = por %p1090_p4, %p1089_p11 }
  0x27   : > { %p1092_p7 = pnand %p1091_p5, %p1085_p12 }
  0x29   : > { %1095 = shalt.err (!%p1092_p7)
}
  0x2a   : > { %s1165_s21 = smov 2048   ;;  %s1166_s22 = smov 128  }
  0x2b   : > { %1022 = dma.hbm_to_vmem [thread:$0]  (!%p1248_p13), %s1244_s25, 32768, %s1252_s27, %s1254_s29, %s1165_s21, %s1165_s21, %s1166_s22  }
  0x2c   : > { %p1002_p9 = scmp.ge.s32.totalorder %s1162_s9, 1  ;;  %p107_p1 = scmp.lt.s32.totalorder %s1162_s9, 3 }
  0x2e   : > { %p108_p3 = pnand %p1002_p9, %p107_p1 }
  0x2f   : > { %s1285_s23 = sand.u32 (!%p108_p3), 1, %s1154_s7  }
  0x30   : > { %111 = sbr.rel (%p108_p3) target bundleno = 201 (0xc9), region = 24  ;;  %s1003_s24 = sshll.u32 (!%p108_p3), %s1285_s23, 11 }
  0x31   : > { %s114_s26 = scalar_lea.sflag (!%p108_p3), [#allocation3], %s1285_s23  ;;  %s1289_s30 = scalar_lea.vmem (!%p108_p3), [#allocation2], %s1003_s24 }
  0x37   : > { %1141 = dma.done.wait (%p1224_p6), %s114_s26, 32768  }
  0x38   : > { %1143 = vsyncadd (%p1224_p6), %s114_s26, 4294934528  ;;  %v139_v0 = vld [vmem:[%s1289_s30] sm:$0xff]  ;;  %v140_v1 = vld [vmem:[%s1289_s30 + $0x8] sm:$0xff]  ;;  %v1167_v3 = vmov 0   ;;  %s1310_s17 = scalar_lea.vmem [#allocation5], %s1003_s24  ;;  %s1014_s25 = sshll.u32 %s1202_s10, 15 }
  0x39   : > { %v141_v2 = vld [vmem:[%s1289_s30 + $0x10] sm:$0xff]  ;;  %v395_v4 = vmax.bf16 %v1167_v3, %v139_v0  ;;  %v396_v5 = vmax.bf16 %v1167_v3, %v140_v1  ;;  %v142_v7 = vld [vmem:[%s1289_s30 + $0x18] sm:$0xff]  ;;  %v143_v8 = vld [vmem:[%s1289_s30 + $0x20] sm:$0xff]  ;;  %s922_s27 = sshll.u32 %s1310_s17, 4  ;;  %s2062_s29 = scalar_lea.hbm %s2117_s1, %s1014_s25  ;;  %s2064_s27 = int_to_ptr.vmem [resolvable:$true] %s922_s27 }
  0x3a   : > { %v397_v6 = vmax.bf16 %v1167_v3, %v141_v2  ;;  %v144_v9 = vld [vmem:[%s1289_s30 + $0x28] sm:$0xff]  ;;  %v398_v10 = vmax.bf16 %v1167_v3, %v142_v7  ;;  %v399_v11 = vmax.bf16 %v1167_v3, %v143_v8  ;;  %v145_v13 = vld [vmem:[%s1289_s30 + $0x30] sm:$0xff]  ;;  %v146_v14 = vld [vmem:[%s1289_s30 + $0x38] sm:$0xff]  ;;  %s908_s2 = scalar_lea.sflag [#allocation4], %s1285_s23  ;;  %s1096_s3 = scalar_lea.vmem %s2064_s27, 32768 }
  0x3b   : > { %v400_v12 = vmax.bf16 %v1167_v3, %v144_v9  ;;  %v147_v15 = vld [vmem:[%s1289_s30 + $0x40] sm:$0xff]  ;;  %651 = vst [vmem:[%s1310_s17] sm:$0xff] %v395_v4  ;;  %652 = vst [vmem:[%s1310_s17 + $0x8] sm:$0xff] %v396_v5  ;;  %v401_v16 = vmax.bf16 %v1167_v3, %v145_v13  ;;  %v402_v17 = vmax.bf16 %v1167_v3, %v146_v14  ;;  %v148_v19 = vld [vmem:[%s1289_s30 + $0x48] sm:$0xff]  ;;  %p1097_p6 = scmp.ne.s32.totalorder %s2064_s27, %s1096_s3  ;;  %p2124_p11 = scmp.ne.s32.totalorder %s2121_s18, 0 }
  0x3c   : > { %653 = vst [vmem:[%s1310_s17 + $0x10] sm:$0xff] %v397_v6  ;;  %v403_v18 = vmax.bf16 %v1167_v3, %v147_v15  ;;  %v149_v20 = vld [vmem:[%s1289_s30 + $0x50] sm:$0xff]  ;;  %v150_v21 = vld [vmem:[%s1289_s30 + $0x58] sm:$0xff]  ;;  %654 = vst [vmem:[%s1310_s17 + $0x18] sm:$0xff] %v398_v10  ;;  %v404_v22 = vmax.bf16 %v1167_v3, %v148_v19  ;;  %s1168_s4 = smov [#allocation5]  }
  0x3d   : > { %655 = vst [vmem:[%s1310_s17 + $0x20] sm:$0xff] %v399_v11  ;;  %656 = vst [vmem:[%s1310_s17 + $0x28] sm:$0xff] %v400_v12  ;;  %v405_v23 = vmax.bf16 %v1167_v3, %v149_v20  ;;  %v406_v24 = vmax.bf16 %v1167_v3, %v150_v21  ;;  %v151_v25 = vld [vmem:[%s1289_s30 + $0x60] sm:$0xff]  ;;  %v152_v26 = vld [vmem:[%s1289_s30 + $0x68] sm:$0xff]  ;;  %p1098_p12 = pnand %p1097_p6, %p2124_p11  ;;  %s1100_s5 = sshll.u32 %s1168_s4, 4  ;;  %s1101_s5 = int_to_ptr.vmem [resolvable:$false] %s1100_s5 }
  0x3e   : > { %v153_v27 = vld [vmem:[%s1289_s30 + $0x70] sm:$0xff]  ;;  %657 = vst [vmem:[%s1310_s17 + $0x30] sm:$0xff] %v401_v16  ;;  %658 = vst [vmem:[%s1310_s17 + $0x38] sm:$0xff] %v402_v17  ;;  %v407_v28 = vmax.bf16 %v1167_v3, %v151_v25  ;;  %v408_v29 = vmax.bf16 %v1167_v3, %v152_v26  ;;  %v154_v31 = vld [vmem:[%s1289_s30 + $0x78] sm:$0xff]  ;;  %s1102_s11 = scalar_lea.vmem %s1101_s5, 65536  ;;  %p1103_p8 = scmp.lt.s32.totalorder %s2064_s27, %s1101_s5 }
  0x3f   : > { %659 = vst [vmem:[%s1310_s17 + $0x40] sm:$0xff] %v403_v18  ;;  %v409_v30 = vmax.bf16 %v1167_v3, %v153_v27  ;;  %v155_v32 = vld [vmem:[%s1289_s30 + $0x80] sm:$0xff]  ;;  %v156_v33 = vld [vmem:[%s1289_s30 + $0x88] sm:$0xff]  ;;  %660 = vst [vmem:[%s1310_s17 + $0x48] sm:$0xff] %v404_v22  ;;  %v410_v34 = vmax.bf16 %v1167_v3, %v154_v31  ;;  %p1099_p13 = pneg %p1098_p12  ;;  %p1104_p10 = scmp.lt.s32.totalorder %s1102_s11, %s1096_s3 }
  0x40   : > { %661 = vst [vmem:[%s1310_s17 + $0x50] sm:$0xff] %v405_v23  ;;  %662 = vst [vmem:[%s1310_s17 + $0x58] sm:$0xff] %v406_v24  ;;  %v411_v35 = vmax.bf16 %v1167_v3, %v155_v32  ;;  %v412_v36 = vmax.bf16 %v1167_v3, %v156_v33  ;;  %v157_v37 = vld [vmem:[%s1289_s30 + $0x90] sm:$0xff]  ;;  %v158_v38 = vld [vmem:[%s1289_s30 + $0x98] sm:$0xff] }
  0x41   : > { %v159_v39 = vld [vmem:[%s1289_s30 + $0xa0] sm:$0xff]  ;;  %663 = vst [vmem:[%s1310_s17 + $0x60] sm:$0xff] %v407_v28  ;;  %664 = vst [vmem:[%s1310_s17 + $0x68] sm:$0xff] %v408_v29  ;;  %v413_v40 = vmax.bf16 %v1167_v3, %v157_v37  ;;  %v414_v41 = vmax.bf16 %v1167_v3, %v158_v38  ;;  %v160_v43 = vld [vmem:[%s1289_s30 + $0xa8] sm:$0xff]  ;;  %p1105_p0 = por %p1104_p10, %p1103_p8 }
  0x42   : > { %665 = vst [vmem:[%s1310_s17 + $0x70] sm:$0xff] %v409_v30  ;;  %v415_v42 = vmax.bf16 %v1167_v3, %v159_v39  ;;  %v161_v44 = vld [vmem:[%s1289_s30 + $0xb0] sm:$0xff]  ;;  %v162_v45 = vld [vmem:[%s1289_s30 + $0xb8] sm:$0xff]  ;;  %666 = vst [vmem:[%s1310_s17 + $0x78] sm:$0xff] %v410_v34  ;;  %v416_v46 = vmax.bf16 %v1167_v3, %v160_v43 }
  0x43   : > { %667 = vst [vmem:[%s1310_s17 + $0x80] sm:$0xff] %v411_v35  ;;  %668 = vst [vmem:[%s1310_s17 + $0x88] sm:$0xff] %v412_v36  ;;  %v417_v47 = vmax.bf16 %v1167_v3, %v161_v44  ;;  %v418_v48 = vmax.bf16 %v1167_v3, %v162_v45  ;;  %v163_v49 = vld [vmem:[%s1289_s30 + $0xc0] sm:$0xff]  ;;  %v164_v50 = vld [vmem:[%s1289_s30 + $0xc8] sm:$0xff]  ;;  %p1106_p2 = pnand %p1105_p0, %p1099_p13 }
  0x44   : > { %v165_v51 = vld [vmem:[%s1289_s30 + $0xd0] sm:$0xff]  ;;  %669 = vst [vmem:[%s1310_s17 + $0x90] sm:$0xff] %v413_v40  ;;  %670 = vst [vmem:[%s1310_s17 + $0x98] sm:$0xff] %v414_v41  ;;  %v419_v52 = vmax.bf16 %v1167_v3, %v163_v49  ;;  %v420_v53 = vmax.bf16 %v1167_v3, %v164_v50  ;;  %v166_v55 = vld [vmem:[%s1289_s30 + $0xd8] sm:$0xff] }
  0x45   : > { %671 = vst [vmem:[%s1310_s17 + $0xa0] sm:$0xff] %v415_v42  ;;  %v421_v54 = vmax.bf16 %v1167_v3, %v165_v51  ;;  %v167_v56 = vld [vmem:[%s1289_s30 + $0xe0] sm:$0xff]  ;;  %v168_v57 = vld [vmem:[%s1289_s30 + $0xe8] sm:$0xff]  ;;  %672 = vst [vmem:[%s1310_s17 + $0xa8] sm:$0xff] %v416_v46  ;;  %v422_v58 = vmax.bf16 %v1167_v3, %v166_v55 }
  0x46   : > { %673 = vst [vmem:[%s1310_s17 + $0xb0] sm:$0xff] %v417_v47  ;;  %674 = vst [vmem:[%s1310_s17 + $0xb8] sm:$0xff] %v418_v48  ;;  %v423_v59 = vmax.bf16 %v1167_v3, %v167_v56  ;;  %v424_v60 = vmax.bf16 %v1167_v3, %v168_v57  ;;  %v169_v61 = vld [vmem:[%s1289_s30 + $0xf0] sm:$0xff]  ;;  %v170_v62 = vld [vmem:[%s1289_s30 + $0xf8] sm:$0xff] }
  0x47   : > { %v171_v63 = vld [vmem:[%s1289_s30 + $0x100] sm:$0xff]  ;;  %675 = vst [vmem:[%s1310_s17 + $0xc0] sm:$0xff] %v419_v52  ;;  %676 = vst [vmem:[%s1310_s17 + $0xc8] sm:$0xff] %v420_v53  ;;  %v425_v0 = vmax.bf16 %v1167_v3, %v169_v61  ;;  %v426_v1 = vmax.bf16 %v1167_v3, %v170_v62  ;;  %v172_v4 = vld [vmem:[%s1289_s30 + $0x108] sm:$0xff] }
  0x48   : > { %677 = vst [vmem:[%s1310_s17 + $0xd0] sm:$0xff] %v421_v54  ;;  %v427_v2 = vmax.bf16 %v1167_v3, %v171_v63  ;;  %v173_v5 = vld [vmem:[%s1289_s30 + $0x110] sm:$0xff]  ;;  %v174_v6 = vld [vmem:[%s1289_s30 + $0x118] sm:$0xff]  ;;  %678 = vst [vmem:[%s1310_s17 + $0xd8] sm:$0xff] %v422_v58  ;;  %v428_v7 = vmax.bf16 %v1167_v3, %v172_v4 }
  0x49   : > { %679 = vst [vmem:[%s1310_s17 + $0xe0] sm:$0xff] %v423_v59  ;;  %680 = vst [vmem:[%s1310_s17 + $0xe8] sm:$0xff] %v424_v60  ;;  %v429_v8 = vmax.bf16 %v1167_v3, %v173_v5  ;;  %v430_v9 = vmax.bf16 %v1167_v3, %v174_v6  ;;  %v175_v10 = vld [vmem:[%s1289_s30 + $0x120] sm:$0xff]  ;;  %v176_v11 = vld [vmem:[%s1289_s30 + $0x128] sm:$0xff] }
  0x4a   : > { %v177_v12 = vld [vmem:[%s1289_s30 + $0x130] sm:$0xff]  ;;  %681 = vst [vmem:[%s1310_s17 + $0xf0] sm:$0xff] %v425_v0  ;;  %682 = vst [vmem:[%s1310_s17 + $0xf8] sm:$0xff] %v426_v1  ;;  %v431_v13 = vmax.bf16 %v1167_v3, %v175_v10  ;;  %v432_v14 = vmax.bf16 %v1167_v3, %v176_v11  ;;  %v178_v16 = vld [vmem:[%s1289_s30 + $0x138] sm:$0xff] }
  0x4b   : > { %683 = vst [vmem:[%s1310_s17 + $0x100] sm:$0xff] %v427_v2  ;;  %v433_v15 = vmax.bf16 %v1167_v3, %v177_v12  ;;  %v179_v17 = vld [vmem:[%s1289_s30 + $0x140] sm:$0xff]  ;;  %v180_v18 = vld [vmem:[%s1289_s30 + $0x148] sm:$0xff]  ;;  %684 = vst [vmem:[%s1310_s17 + $0x108] sm:$0xff] %v428_v7  ;;  %v434_v19 = vmax.bf16 %v1167_v3, %v178_v16 }
  0x4c   : > { %685 = vst [vmem:[%s1310_s17 + $0x110] sm:$0xff] %v429_v8  ;;  %686 = vst [vmem:[%s1310_s17 + $0x118] sm:$0xff] %v430_v9  ;;  %v435_v20 = vmax.bf16 %v1167_v3, %v179_v17  ;;  %v436_v21 = vmax.bf16 %v1167_v3, %v180_v18  ;;  %v181_v22 = vld [vmem:[%s1289_s30 + $0x150] sm:$0xff]  ;;  %v182_v23 = vld [vmem:[%s1289_s30 + $0x158] sm:$0xff] }
  0x4d   : > { %v183_v24 = vld [vmem:[%s1289_s30 + $0x160] sm:$0xff]  ;;  %687 = vst [vmem:[%s1310_s17 + $0x120] sm:$0xff] %v431_v13  ;;  %688 = vst [vmem:[%s1310_s17 + $0x128] sm:$0xff] %v432_v14  ;;  %v437_v25 = vmax.bf16 %v1167_v3, %v181_v22  ;;  %v438_v26 = vmax.bf16 %v1167_v3, %v182_v23  ;;  %v184_v28 = vld [vmem:[%s1289_s30 + $0x168] sm:$0xff] }
  0x4e   : > { %689 = vst [vmem:[%s1310_s17 + $0x130] sm:$0xff] %v433_v15  ;;  %v439_v27 = vmax.bf16 %v1167_v3, %v183_v24  ;;  %v185_v29 = vld [vmem:[%s1289_s30 + $0x170] sm:$0xff]  ;;  %v186_v30 = vld [vmem:[%s1289_s30 + $0x178] sm:$0xff]  ;;  %690 = vst [vmem:[%s1310_s17 + $0x138] sm:$0xff] %v434_v19  ;;  %v440_v31 = vmax.bf16 %v1167_v3, %v184_v28 }
  0x4f   : > { %691 = vst [vmem:[%s1310_s17 + $0x140] sm:$0xff] %v435_v20  ;;  %692 = vst [vmem:[%s1310_s17 + $0x148] sm:$0xff] %v436_v21  ;;  %v441_v32 = vmax.bf16 %v1167_v3, %v185_v29  ;;  %v442_v33 = vmax.bf16 %v1167_v3, %v186_v30  ;;  %v187_v34 = vld [vmem:[%s1289_s30 + $0x180] sm:$0xff]  ;;  %v188_v35 = vld [vmem:[%s1289_s30 + $0x188] sm:$0xff] }
  0x50   : > { %v189_v36 = vld [vmem:[%s1289_s30 + $0x190] sm:$0xff]  ;;  %693 = vst [vmem:[%s1310_s17 + $0x150] sm:$0xff] %v437_v25  ;;  %694 = vst [vmem:[%s1310_s17 + $0x158] sm:$0xff] %v438_v26  ;;  %v443_v37 = vmax.bf16 %v1167_v3, %v187_v34  ;;  %v444_v38 = vmax.bf16 %v1167_v3, %v188_v35  ;;  %v190_v40 = vld [vmem:[%s1289_s30 + $0x198] sm:$0xff] }
  0x51   : > { %695 = vst [vmem:[%s1310_s17 + $0x160] sm:$0xff] %v439_v27  ;;  %v445_v39 = vmax.bf16 %v1167_v3, %v189_v36  ;;  %v191_v41 = vld [vmem:[%s1289_s30 + $0x1a0] sm:$0xff]  ;;  %v192_v42 = vld [vmem:[%s1289_s30 + $0x1a8] sm:$0xff]  ;;  %696 = vst [vmem:[%s1310_s17 + $0x168] sm:$0xff] %v440_v31  ;;  %v446_v43 = vmax.bf16 %v1167_v3, %v190_v40 }
  0x52   : > { %697 = vst [vmem:[%s1310_s17 + $0x170] sm:$0xff] %v441_v32  ;;  %698 = vst [vmem:[%s1310_s17 + $0x178] sm:$0xff] %v442_v33  ;;  %v447_v44 = vmax.bf16 %v1167_v3, %v191_v41  ;;  %v448_v45 = vmax.bf16 %v1167_v3, %v192_v42  ;;  %v193_v46 = vld [vmem:[%s1289_s30 + $0x1b0] sm:$0xff]  ;;  %v194_v47 = vld [vmem:[%s1289_s30 + $0x1b8] sm:$0xff] }
  0x53   : > { %v195_v48 = vld [vmem:[%s1289_s30 + $0x1c0] sm:$0xff]  ;;  %699 = vst [vmem:[%s1310_s17 + $0x180] sm:$0xff] %v443_v37  ;;  %700 = vst [vmem:[%s1310_s17 + $0x188] sm:$0xff] %v444_v38  ;;  %v449_v49 = vmax.bf16 %v1167_v3, %v193_v46  ;;  %v450_v50 = vmax.bf16 %v1167_v3, %v194_v47  ;;  %v196_v52 = vld [vmem:[%s1289_s30 + $0x1c8] sm:$0xff] }
  0x54   : > { %701 = vst [vmem:[%s1310_s17 + $0x190] sm:$0xff] %v445_v39  ;;  %v451_v51 = vmax.bf16 %v1167_v3, %v195_v48  ;;  %v197_v53 = vld [vmem:[%s1289_s30 + $0x1d0] sm:$0xff]  ;;  %v198_v54 = vld [vmem:[%s1289_s30 + $0x1d8] sm:$0xff]  ;;  %702 = vst [vmem:[%s1310_s17 + $0x198] sm:$0xff] %v446_v43  ;;  %v452_v55 = vmax.bf16 %v1167_v3, %v196_v52 }
  0x55   : > { %703 = vst [vmem:[%s1310_s17 + $0x1a0] sm:$0xff] %v447_v44  ;;  %704 = vst [vmem:[%s1310_s17 + $0x1a8] sm:$0xff] %v448_v45  ;;  %v453_v56 = vmax.bf16 %v1167_v3, %v197_v53  ;;  %v454_v57 = vmax.bf16 %v1167_v3, %v198_v54  ;;  %v199_v58 = vld [vmem:[%s1289_s30 + $0x1e0] sm:$0xff]  ;;  %v200_v59 = vld [vmem:[%s1289_s30 + $0x1e8] sm:$0xff] }
  0x56   : > { %v201_v60 = vld [vmem:[%s1289_s30 + $0x1f0] sm:$0xff]  ;;  %705 = vst [vmem:[%s1310_s17 + $0x1b0] sm:$0xff] %v449_v49  ;;  %706 = vst [vmem:[%s1310_s17 + $0x1b8] sm:$0xff] %v450_v50  ;;  %v455_v61 = vmax.bf16 %v1167_v3, %v199_v58  ;;  %v456_v62 = vmax.bf16 %v1167_v3, %v200_v59  ;;  %v202_v0 = vld [vmem:[%s1289_s30 + $0x1f8] sm:$0xff] }
  0x57   : > { %707 = vst [vmem:[%s1310_s17 + $0x1c0] sm:$0xff] %v451_v51  ;;  %v457_v63 = vmax.bf16 %v1167_v3, %v201_v60  ;;  %v203_v1 = vld [vmem:[%s1289_s30 + $0x200] sm:$0xff]  ;;  %v204_v2 = vld [vmem:[%s1289_s30 + $0x208] sm:$0xff]  ;;  %708 = vst [vmem:[%s1310_s17 + $0x1c8] sm:$0xff] %v452_v55  ;;  %v458_v4 = vmax.bf16 %v1167_v3, %v202_v0 }
  0x58   : > { %709 = vst [vmem:[%s1310_s17 + $0x1d0] sm:$0xff] %v453_v56  ;;  %710 = vst [vmem:[%s1310_s17 + $0x1d8] sm:$0xff] %v454_v57  ;;  %v459_v5 = vmax.bf16 %v1167_v3, %v203_v1  ;;  %v460_v6 = vmax.bf16 %v1167_v3, %v204_v2  ;;  %v205_v7 = vld [vmem:[%s1289_s30 + $0x210] sm:$0xff]  ;;  %v206_v8 = vld [vmem:[%s1289_s30 + $0x218] sm:$0xff] }
  0x59   : > { %v207_v9 = vld [vmem:[%s1289_s30 + $0x220] sm:$0xff]  ;;  %711 = vst [vmem:[%s1310_s17 + $0x1e0] sm:$0xff] %v455_v61  ;;  %712 = vst [vmem:[%s1310_s17 + $0x1e8] sm:$0xff] %v456_v62  ;;  %v461_v10 = vmax.bf16 %v1167_v3, %v205_v7  ;;  %v462_v11 = vmax.bf16 %v1167_v3, %v206_v8  ;;  %v208_v13 = vld [vmem:[%s1289_s30 + $0x228] sm:$0xff] }
  0x5a   : > { %713 = vst [vmem:[%s1310_s17 + $0x1f0] sm:$0xff] %v457_v63  ;;  %v463_v12 = vmax.bf16 %v1167_v3, %v207_v9  ;;  %v209_v14 = vld [vmem:[%s1289_s30 + $0x230] sm:$0xff]  ;;  %v210_v15 = vld [vmem:[%s1289_s30 + $0x238] sm:$0xff]  ;;  %714 = vst [vmem:[%s1310_s17 + $0x1f8] sm:$0xff] %v458_v4  ;;  %v464_v16 = vmax.bf16 %v1167_v3, %v208_v13 }
  0x5b   : > { %715 = vst [vmem:[%s1310_s17 + $0x200] sm:$0xff] %v459_v5  ;;  %716 = vst [vmem:[%s1310_s17 + $0x208] sm:$0xff] %v460_v6  ;;  %v465_v17 = vmax.bf16 %v1167_v3, %v209_v14  ;;  %v466_v18 = vmax.bf16 %v1167_v3, %v210_v15  ;;  %v211_v19 = vld [vmem:[%s1289_s30 + $0x240] sm:$0xff]  ;;  %v212_v20 = vld [vmem:[%s1289_s30 + $0x248] sm:$0xff] }
  0x5c   : > { %v213_v21 = vld [vmem:[%s1289_s30 + $0x250] sm:$0xff]  ;;  %717 = vst [vmem:[%s1310_s17 + $0x210] sm:$0xff] %v461_v10  ;;  %718 = vst [vmem:[%s1310_s17 + $0x218] sm:$0xff] %v462_v11  ;;  %v467_v22 = vmax.bf16 %v1167_v3, %v211_v19  ;;  %v468_v23 = vmax.bf16 %v1167_v3, %v212_v20  ;;  %v214_v25 = vld [vmem:[%s1289_s30 + $0x258] sm:$0xff] }
  0x5d   : > { %719 = vst [vmem:[%s1310_s17 + $0x220] sm:$0xff] %v463_v12  ;;  %v469_v24 = vmax.bf16 %v1167_v3, %v213_v21  ;;  %v215_v26 = vld [vmem:[%s1289_s30 + $0x260] sm:$0xff]  ;;  %v216_v27 = vld [vmem:[%s1289_s30 + $0x268] sm:$0xff]  ;;  %720 = vst [vmem:[%s1310_s17 + $0x228] sm:$0xff] %v464_v16  ;;  %v470_v28 = vmax.bf16 %v1167_v3, %v214_v25 }
  0x5e   : > { %721 = vst [vmem:[%s1310_s17 + $0x230] sm:$0xff] %v465_v17  ;;  %722 = vst [vmem:[%s1310_s17 + $0x238] sm:$0xff] %v466_v18  ;;  %v471_v29 = vmax.bf16 %v1167_v3, %v215_v26  ;;  %v472_v30 = vmax.bf16 %v1167_v3, %v216_v27  ;;  %v217_v31 = vld [vmem:[%s1289_s30 + $0x270] sm:$0xff]  ;;  %v218_v32 = vld [vmem:[%s1289_s30 + $0x278] sm:$0xff] }
  0x5f   : > { %v219_v33 = vld [vmem:[%s1289_s30 + $0x280] sm:$0xff]  ;;  %723 = vst [vmem:[%s1310_s17 + $0x240] sm:$0xff] %v467_v22  ;;  %724 = vst [vmem:[%s1310_s17 + $0x248] sm:$0xff] %v468_v23  ;;  %v473_v34 = vmax.bf16 %v1167_v3, %v217_v31  ;;  %v474_v35 = vmax.bf16 %v1167_v3, %v218_v32  ;;  %v220_v37 = vld [vmem:[%s1289_s30 + $0x288] sm:$0xff] }
  0x60   : > { %725 = vst [vmem:[%s1310_s17 + $0x250] sm:$0xff] %v469_v24  ;;  %v475_v36 = vmax.bf16 %v1167_v3, %v219_v33  ;;  %v221_v38 = vld [vmem:[%s1289_s30 + $0x290] sm:$0xff]  ;;  %v222_v39 = vld [vmem:[%s1289_s30 + $0x298] sm:$0xff]  ;;  %726 = vst [vmem:[%s1310_s17 + $0x258] sm:$0xff] %v470_v28  ;;  %v476_v40 = vmax.bf16 %v1167_v3, %v220_v37 }
  0x61   : > { %727 = vst [vmem:[%s1310_s17 + $0x260] sm:$0xff] %v471_v29  ;;  %728 = vst [vmem:[%s1310_s17 + $0x268] sm:$0xff] %v472_v30  ;;  %v477_v41 = vmax.bf16 %v1167_v3, %v221_v38  ;;  %v478_v42 = vmax.bf16 %v1167_v3, %v222_v39  ;;  %v223_v43 = vld [vmem:[%s1289_s30 + $0x2a0] sm:$0xff]  ;;  %v224_v44 = vld [vmem:[%s1289_s30 + $0x2a8] sm:$0xff] }
  0x62   : > { %v225_v45 = vld [vmem:[%s1289_s30 + $0x2b0] sm:$0xff]  ;;  %729 = vst [vmem:[%s1310_s17 + $0x270] sm:$0xff] %v473_v34  ;;  %730 = vst [vmem:[%s1310_s17 + $0x278] sm:$0xff] %v474_v35  ;;  %v479_v46 = vmax.bf16 %v1167_v3, %v223_v43  ;;  %v480_v47 = vmax.bf16 %v1167_v3, %v224_v44  ;;  %v226_v49 = vld [vmem:[%s1289_s30 + $0x2b8] sm:$0xff] }
  0x63   : > { %731 = vst [vmem:[%s1310_s17 + $0x280] sm:$0xff] %v475_v36  ;;  %v481_v48 = vmax.bf16 %v1167_v3, %v225_v45  ;;  %v227_v50 = vld [vmem:[%s1289_s30 + $0x2c0] sm:$0xff]  ;;  %v228_v51 = vld [vmem:[%s1289_s30 + $0x2c8] sm:$0xff]  ;;  %732 = vst [vmem:[%s1310_s17 + $0x288] sm:$0xff] %v476_v40  ;;  %v482_v52 = vmax.bf16 %v1167_v3, %v226_v49 }
  0x64   : > { %733 = vst [vmem:[%s1310_s17 + $0x290] sm:$0xff] %v477_v41  ;;  %734 = vst [vmem:[%s1310_s17 + $0x298] sm:$0xff] %v478_v42  ;;  %v483_v53 = vmax.bf16 %v1167_v3, %v227_v50  ;;  %v484_v54 = vmax.bf16 %v1167_v3, %v228_v51  ;;  %v229_v55 = vld [vmem:[%s1289_s30 + $0x2d0] sm:$0xff]  ;;  %v230_v56 = vld [vmem:[%s1289_s30 + $0x2d8] sm:$0xff] }
  0x65   : > { %v231_v57 = vld [vmem:[%s1289_s30 + $0x2e0] sm:$0xff]  ;;  %735 = vst [vmem:[%s1310_s17 + $0x2a0] sm:$0xff] %v479_v46  ;;  %736 = vst [vmem:[%s1310_s17 + $0x2a8] sm:$0xff] %v480_v47  ;;  %v485_v58 = vmax.bf16 %v1167_v3, %v229_v55  ;;  %v486_v59 = vmax.bf16 %v1167_v3, %v230_v56  ;;  %v232_v61 = vld [vmem:[%s1289_s30 + $0x2e8] sm:$0xff] }
  0x66   : > { %737 = vst [vmem:[%s1310_s17 + $0x2b0] sm:$0xff] %v481_v48  ;;  %v487_v60 = vmax.bf16 %v1167_v3, %v231_v57  ;;  %v233_v62 = vld [vmem:[%s1289_s30 + $0x2f0] sm:$0xff]  ;;  %v234_v63 = vld [vmem:[%s1289_s30 + $0x2f8] sm:$0xff]  ;;  %738 = vst [vmem:[%s1310_s17 + $0x2b8] sm:$0xff] %v482_v52  ;;  %v488_v0 = vmax.bf16 %v1167_v3, %v232_v61 }
  0x67   : > { %739 = vst [vmem:[%s1310_s17 + $0x2c0] sm:$0xff] %v483_v53  ;;  %740 = vst [vmem:[%s1310_s17 + $0x2c8] sm:$0xff] %v484_v54  ;;  %v489_v1 = vmax.bf16 %v1167_v3, %v233_v62  ;;  %v490_v2 = vmax.bf16 %v1167_v3, %v234_v63  ;;  %v235_v4 = vld [vmem:[%s1289_s30 + $0x300] sm:$0xff]  ;;  %v236_v5 = vld [vmem:[%s1289_s30 + $0x308] sm:$0xff] }
  0x68   : > { %v237_v6 = vld [vmem:[%s1289_s30 + $0x310] sm:$0xff]  ;;  %741 = vst [vmem:[%s1310_s17 + $0x2d0] sm:$0xff] %v485_v58  ;;  %742 = vst [vmem:[%s1310_s17 + $0x2d8] sm:$0xff] %v486_v59  ;;  %v491_v7 = vmax.bf16 %v1167_v3, %v235_v4  ;;  %v492_v8 = vmax.bf16 %v1167_v3, %v236_v5  ;;  %v238_v10 = vld [vmem:[%s1289_s30 + $0x318] sm:$0xff] }
  0x69   : > { %743 = vst [vmem:[%s1310_s17 + $0x2e0] sm:$0xff] %v487_v60  ;;  %v493_v9 = vmax.bf16 %v1167_v3, %v237_v6  ;;  %v239_v11 = vld [vmem:[%s1289_s30 + $0x320] sm:$0xff]  ;;  %v240_v12 = vld [vmem:[%s1289_s30 + $0x328] sm:$0xff]  ;;  %744 = vst [vmem:[%s1310_s17 + $0x2e8] sm:$0xff] %v488_v0  ;;  %v494_v13 = vmax.bf16 %v1167_v3, %v238_v10 }
  0x6a   : > { %745 = vst [vmem:[%s1310_s17 + $0x2f0] sm:$0xff] %v489_v1  ;;  %746 = vst [vmem:[%s1310_s17 + $0x2f8] sm:$0xff] %v490_v2  ;;  %v495_v14 = vmax.bf16 %v1167_v3, %v239_v11  ;;  %v496_v15 = vmax.bf16 %v1167_v3, %v240_v12  ;;  %v241_v16 = vld [vmem:[%s1289_s30 + $0x330] sm:$0xff]  ;;  %v242_v17 = vld [vmem:[%s1289_s30 + $0x338] sm:$0xff] }
  0x6b   : > { %v243_v18 = vld [vmem:[%s1289_s30 + $0x340] sm:$0xff]  ;;  %747 = vst [vmem:[%s1310_s17 + $0x300] sm:$0xff] %v491_v7  ;;  %748 = vst [vmem:[%s1310_s17 + $0x308] sm:$0xff] %v492_v8  ;;  %v497_v19 = vmax.bf16 %v1167_v3, %v241_v16  ;;  %v498_v20 = vmax.bf16 %v1167_v3, %v242_v17  ;;  %v244_v22 = vld [vmem:[%s1289_s30 + $0x348] sm:$0xff] }
  0x6c   : > { %749 = vst [vmem:[%s1310_s17 + $0x310] sm:$0xff] %v493_v9  ;;  %v499_v21 = vmax.bf16 %v1167_v3, %v243_v18  ;;  %v245_v23 = vld [vmem:[%s1289_s30 + $0x350] sm:$0xff]  ;;  %v246_v24 = vld [vmem:[%s1289_s30 + $0x358] sm:$0xff]  ;;  %750 = vst [vmem:[%s1310_s17 + $0x318] sm:$0xff] %v494_v13  ;;  %v500_v25 = vmax.bf16 %v1167_v3, %v244_v22 }
  0x6d   : > { %751 = vst [vmem:[%s1310_s17 + $0x320] sm:$0xff] %v495_v14  ;;  %752 = vst [vmem:[%s1310_s17 + $0x328] sm:$0xff] %v496_v15  ;;  %v501_v26 = vmax.bf16 %v1167_v3, %v245_v23  ;;  %v502_v27 = vmax.bf16 %v1167_v3, %v246_v24  ;;  %v247_v28 = vld [vmem:[%s1289_s30 + $0x360] sm:$0xff]  ;;  %v248_v29 = vld [vmem:[%s1289_s30 + $0x368] sm:$0xff] }
  0x6e   : > { %v249_v30 = vld [vmem:[%s1289_s30 + $0x370] sm:$0xff]  ;;  %753 = vst [vmem:[%s1310_s17 + $0x330] sm:$0xff] %v497_v19  ;;  %754 = vst [vmem:[%s1310_s17 + $0x338] sm:$0xff] %v498_v20  ;;  %v503_v31 = vmax.bf16 %v1167_v3, %v247_v28  ;;  %v504_v32 = vmax.bf16 %v1167_v3, %v248_v29  ;;  %v250_v34 = vld [vmem:[%s1289_s30 + $0x378] sm:$0xff] }
  0x6f   : > { %755 = vst [vmem:[%s1310_s17 + $0x340] sm:$0xff] %v499_v21  ;;  %v505_v33 = vmax.bf16 %v1167_v3, %v249_v30  ;;  %v251_v35 = vld [vmem:[%s1289_s30 + $0x380] sm:$0xff]  ;;  %v252_v36 = vld [vmem:[%s1289_s30 + $0x388] sm:$0xff]  ;;  %756 = vst [vmem:[%s1310_s17 + $0x348] sm:$0xff] %v500_v25  ;;  %v506_v37 = vmax.bf16 %v1167_v3, %v250_v34 }
  0x70   : > { %757 = vst [vmem:[%s1310_s17 + $0x350] sm:$0xff] %v501_v26  ;;  %758 = vst [vmem:[%s1310_s17 + $0x358] sm:$0xff] %v502_v27  ;;  %v507_v38 = vmax.bf16 %v1167_v3, %v251_v35  ;;  %v508_v39 = vmax.bf16 %v1167_v3, %v252_v36  ;;  %v253_v40 = vld [vmem:[%s1289_s30 + $0x390] sm:$0xff]  ;;  %v254_v41 = vld [vmem:[%s1289_s30 + $0x398] sm:$0xff] }
  0x71   : > { %v255_v42 = vld [vmem:[%s1289_s30 + $0x3a0] sm:$0xff]  ;;  %759 = vst [vmem:[%s1310_s17 + $0x360] sm:$0xff] %v503_v31  ;;  %760 = vst [vmem:[%s1310_s17 + $0x368] sm:$0xff] %v504_v32  ;;  %v509_v43 = vmax.bf16 %v1167_v3, %v253_v40  ;;  %v510_v44 = vmax.bf16 %v1167_v3, %v254_v41  ;;  %v256_v46 = vld [vmem:[%s1289_s30 + $0x3a8] sm:$0xff] }
  0x72   : > { %761 = vst [vmem:[%s1310_s17 + $0x370] sm:$0xff] %v505_v33  ;;  %v511_v45 = vmax.bf16 %v1167_v3, %v255_v42  ;;  %v257_v47 = vld [vmem:[%s1289_s30 + $0x3b0] sm:$0xff]  ;;  %v258_v48 = vld [vmem:[%s1289_s30 + $0x3b8] sm:$0xff]  ;;  %762 = vst [vmem:[%s1310_s17 + $0x378] sm:$0xff] %v506_v37  ;;  %v512_v49 = vmax.bf16 %v1167_v3, %v256_v46 }
  0x73   : > { %763 = vst [vmem:[%s1310_s17 + $0x380] sm:$0xff] %v507_v38  ;;  %764 = vst [vmem:[%s1310_s17 + $0x388] sm:$0xff] %v508_v39  ;;  %v513_v50 = vmax.bf16 %v1167_v3, %v257_v47  ;;  %v514_v51 = vmax.bf16 %v1167_v3, %v258_v48  ;;  %v259_v52 = vld [vmem:[%s1289_s30 + $0x3c0] sm:$0xff]  ;;  %v260_v53 = vld [vmem:[%s1289_s30 + $0x3c8] sm:$0xff] }
  0x74   : > { %v261_v54 = vld [vmem:[%s1289_s30 + $0x3d0] sm:$0xff]  ;;  %765 = vst [vmem:[%s1310_s17 + $0x390] sm:$0xff] %v509_v43  ;;  %766 = vst [vmem:[%s1310_s17 + $0x398] sm:$0xff] %v510_v44  ;;  %v515_v55 = vmax.bf16 %v1167_v3, %v259_v52  ;;  %v516_v56 = vmax.bf16 %v1167_v3, %v260_v53  ;;  %v262_v58 = vld [vmem:[%s1289_s30 + $0x3d8] sm:$0xff] }
  0x75   : > { %767 = vst [vmem:[%s1310_s17 + $0x3a0] sm:$0xff] %v511_v45  ;;  %v517_v57 = vmax.bf16 %v1167_v3, %v261_v54  ;;  %v263_v59 = vld [vmem:[%s1289_s30 + $0x3e0] sm:$0xff]  ;;  %v264_v60 = vld [vmem:[%s1289_s30 + $0x3e8] sm:$0xff]  ;;  %768 = vst [vmem:[%s1310_s17 + $0x3a8] sm:$0xff] %v512_v49  ;;  %v518_v61 = vmax.bf16 %v1167_v3, %v262_v58 }
  0x76   : > { %769 = vst [vmem:[%s1310_s17 + $0x3b0] sm:$0xff] %v513_v50  ;;  %770 = vst [vmem:[%s1310_s17 + $0x3b8] sm:$0xff] %v514_v51  ;;  %v519_v62 = vmax.bf16 %v1167_v3, %v263_v59  ;;  %v520_v63 = vmax.bf16 %v1167_v3, %v264_v60  ;;  %v265_v0 = vld [vmem:[%s1289_s30 + $0x3f0] sm:$0xff]  ;;  %v266_v1 = vld [vmem:[%s1289_s30 + $0x3f8] sm:$0xff] }
  0x77   : > { %v267_v2 = vld [vmem:[%s1289_s30 + $0x400] sm:$0xff]  ;;  %771 = vst [vmem:[%s1310_s17 + $0x3c0] sm:$0xff] %v515_v55  ;;  %772 = vst [vmem:[%s1310_s17 + $0x3c8] sm:$0xff] %v516_v56  ;;  %v521_v4 = vmax.bf16 %v1167_v3, %v265_v0  ;;  %v522_v5 = vmax.bf16 %v1167_v3, %v266_v1  ;;  %v268_v7 = vld [vmem:[%s1289_s30 + $0x408] sm:$0xff] }
  0x78   : > { %773 = vst [vmem:[%s1310_s17 + $0x3d0] sm:$0xff] %v517_v57  ;;  %v523_v6 = vmax.bf16 %v1167_v3, %v267_v2  ;;  %v269_v8 = vld [vmem:[%s1289_s30 + $0x410] sm:$0xff]  ;;  %v270_v9 = vld [vmem:[%s1289_s30 + $0x418] sm:$0xff]  ;;  %774 = vst [vmem:[%s1310_s17 + $0x3d8] sm:$0xff] %v518_v61  ;;  %v524_v10 = vmax.bf16 %v1167_v3, %v268_v7 }
  0x79   : > { %775 = vst [vmem:[%s1310_s17 + $0x3e0] sm:$0xff] %v519_v62  ;;  %776 = vst [vmem:[%s1310_s17 + $0x3e8] sm:$0xff] %v520_v63  ;;  %v525_v11 = vmax.bf16 %v1167_v3, %v269_v8  ;;  %v526_v12 = vmax.bf16 %v1167_v3, %v270_v9  ;;  %v271_v13 = vld [vmem:[%s1289_s30 + $0x420] sm:$0xff]  ;;  %v272_v14 = vld [vmem:[%s1289_s30 + $0x428] sm:$0xff] }
  0x7a   : > { %v273_v15 = vld [vmem:[%s1289_s30 + $0x430] sm:$0xff]  ;;  %777 = vst [vmem:[%s1310_s17 + $0x3f0] sm:$0xff] %v521_v4  ;;  %778 = vst [vmem:[%s1310_s17 + $0x3f8] sm:$0xff] %v522_v5  ;;  %v527_v16 = vmax.bf16 %v1167_v3, %v271_v13  ;;  %v528_v17 = vmax.bf16 %v1167_v3, %v272_v14  ;;  %v274_v19 = vld [vmem:[%s1289_s30 + $0x438] sm:$0xff] }
  0x7b   : > { %779 = vst [vmem:[%s1310_s17 + $0x400] sm:$0xff] %v523_v6  ;;  %v529_v18 = vmax.bf16 %v1167_v3, %v273_v15  ;;  %v275_v20 = vld [vmem:[%s1289_s30 + $0x440] sm:$0xff]  ;;  %v276_v21 = vld [vmem:[%s1289_s30 + $0x448] sm:$0xff]  ;;  %780 = vst [vmem:[%s1310_s17 + $0x408] sm:$0xff] %v524_v10  ;;  %v530_v22 = vmax.bf16 %v1167_v3, %v274_v19 }
  0x7c   : > { %781 = vst [vmem:[%s1310_s17 + $0x410] sm:$0xff] %v525_v11  ;;  %782 = vst [vmem:[%s1310_s17 + $0x418] sm:$0xff] %v526_v12  ;;  %v531_v23 = vmax.bf16 %v1167_v3, %v275_v20  ;;  %v532_v24 = vmax.bf16 %v1167_v3, %v276_v21  ;;  %v277_v25 = vld [vmem:[%s1289_s30 + $0x450] sm:$0xff]  ;;  %v278_v26 = vld [vmem:[%s1289_s30 + $0x458] sm:$0xff] }
  0x7d   : > { %v279_v27 = vld [vmem:[%s1289_s30 + $0x460] sm:$0xff]  ;;  %783 = vst [vmem:[%s1310_s17 + $0x420] sm:$0xff] %v527_v16  ;;  %784 = vst [vmem:[%s1310_s17 + $0x428] sm:$0xff] %v528_v17  ;;  %v533_v28 = vmax.bf16 %v1167_v3, %v277_v25  ;;  %v534_v29 = vmax.bf16 %v1167_v3, %v278_v26  ;;  %v280_v31 = vld [vmem:[%s1289_s30 + $0x468] sm:$0xff] }
  0x7e   : > { %785 = vst [vmem:[%s1310_s17 + $0x430] sm:$0xff] %v529_v18  ;;  %v535_v30 = vmax.bf16 %v1167_v3, %v279_v27  ;;  %v281_v32 = vld [vmem:[%s1289_s30 + $0x470] sm:$0xff]  ;;  %v282_v33 = vld [vmem:[%s1289_s30 + $0x478] sm:$0xff]  ;;  %786 = vst [vmem:[%s1310_s17 + $0x438] sm:$0xff] %v530_v22  ;;  %v536_v34 = vmax.bf16 %v1167_v3, %v280_v31 }
  0x7f   : > { %787 = vst [vmem:[%s1310_s17 + $0x440] sm:$0xff] %v531_v23  ;;  %788 = vst [vmem:[%s1310_s17 + $0x448] sm:$0xff] %v532_v24  ;;  %v537_v35 = vmax.bf16 %v1167_v3, %v281_v32  ;;  %v538_v36 = vmax.bf16 %v1167_v3, %v282_v33  ;;  %v283_v37 = vld [vmem:[%s1289_s30 + $0x480] sm:$0xff]  ;;  %v284_v38 = vld [vmem:[%s1289_s30 + $0x488] sm:$0xff] }
  0x80   : > { %v285_v39 = vld [vmem:[%s1289_s30 + $0x490] sm:$0xff]  ;;  %789 = vst [vmem:[%s1310_s17 + $0x450] sm:$0xff] %v533_v28  ;;  %790 = vst [vmem:[%s1310_s17 + $0x458] sm:$0xff] %v534_v29  ;;  %v539_v40 = vmax.bf16 %v1167_v3, %v283_v37  ;;  %v540_v41 = vmax.bf16 %v1167_v3, %v284_v38  ;;  %v286_v43 = vld [vmem:[%s1289_s30 + $0x498] sm:$0xff] }
  0x81   : > { %791 = vst [vmem:[%s1310_s17 + $0x460] sm:$0xff] %v535_v30  ;;  %v541_v42 = vmax.bf16 %v1167_v3, %v285_v39  ;;  %v287_v44 = vld [vmem:[%s1289_s30 + $0x4a0] sm:$0xff]  ;;  %v288_v45 = vld [vmem:[%s1289_s30 + $0x4a8] sm:$0xff]  ;;  %792 = vst [vmem:[%s1310_s17 + $0x468] sm:$0xff] %v536_v34  ;;  %v542_v46 = vmax.bf16 %v1167_v3, %v286_v43 }
  0x82   : > { %793 = vst [vmem:[%s1310_s17 + $0x470] sm:$0xff] %v537_v35  ;;  %794 = vst [vmem:[%s1310_s17 + $0x478] sm:$0xff] %v538_v36  ;;  %v543_v47 = vmax.bf16 %v1167_v3, %v287_v44  ;;  %v544_v48 = vmax.bf16 %v1167_v3, %v288_v45  ;;  %v289_v49 = vld [vmem:[%s1289_s30 + $0x4b0] sm:$0xff]  ;;  %v290_v50 = vld [vmem:[%s1289_s30 + $0x4b8] sm:$0xff] }
  0x83   : > { %v291_v51 = vld [vmem:[%s1289_s30 + $0x4c0] sm:$0xff]  ;;  %795 = vst [vmem:[%s1310_s17 + $0x480] sm:$0xff] %v539_v40  ;;  %796 = vst [vmem:[%s1310_s17 + $0x488] sm:$0xff] %v540_v41  ;;  %v545_v52 = vmax.bf16 %v1167_v3, %v289_v49  ;;  %v546_v53 = vmax.bf16 %v1167_v3, %v290_v50  ;;  %v292_v55 = vld [vmem:[%s1289_s30 + $0x4c8] sm:$0xff] }
  0x84   : > { %797 = vst [vmem:[%s1310_s17 + $0x490] sm:$0xff] %v541_v42  ;;  %v547_v54 = vmax.bf16 %v1167_v3, %v291_v51  ;;  %v293_v56 = vld [vmem:[%s1289_s30 + $0x4d0] sm:$0xff]  ;;  %v294_v57 = vld [vmem:[%s1289_s30 + $0x4d8] sm:$0xff]  ;;  %798 = vst [vmem:[%s1310_s17 + $0x498] sm:$0xff] %v542_v46  ;;  %v548_v58 = vmax.bf16 %v1167_v3, %v292_v55 }
  0x85   : > { %799 = vst [vmem:[%s1310_s17 + $0x4a0] sm:$0xff] %v543_v47  ;;  %800 = vst [vmem:[%s1310_s17 + $0x4a8] sm:$0xff] %v544_v48  ;;  %v549_v59 = vmax.bf16 %v1167_v3, %v293_v56  ;;  %v550_v60 = vmax.bf16 %v1167_v3, %v294_v57  ;;  %v295_v61 = vld [vmem:[%s1289_s30 + $0x4e0] sm:$0xff]  ;;  %v296_v62 = vld [vmem:[%s1289_s30 + $0x4e8] sm:$0xff] }
  0x86   : > { %v297_v63 = vld [vmem:[%s1289_s30 + $0x4f0] sm:$0xff]  ;;  %801 = vst [vmem:[%s1310_s17 + $0x4b0] sm:$0xff] %v545_v52  ;;  %802 = vst [vmem:[%s1310_s17 + $0x4b8] sm:$0xff] %v546_v53  ;;  %v551_v0 = vmax.bf16 %v1167_v3, %v295_v61  ;;  %v552_v1 = vmax.bf16 %v1167_v3, %v296_v62  ;;  %v298_v4 = vld [vmem:[%s1289_s30 + $0x4f8] sm:$0xff] }
  0x87   : > { %803 = vst [vmem:[%s1310_s17 + $0x4c0] sm:$0xff] %v547_v54  ;;  %v553_v2 = vmax.bf16 %v1167_v3, %v297_v63  ;;  %v299_v5 = vld [vmem:[%s1289_s30 + $0x500] sm:$0xff]  ;;  %v300_v6 = vld [vmem:[%s1289_s30 + $0x508] sm:$0xff]  ;;  %804 = vst [vmem:[%s1310_s17 + $0x4c8] sm:$0xff] %v548_v58  ;;  %v554_v7 = vmax.bf16 %v1167_v3, %v298_v4 }
  0x88   : > { %805 = vst [vmem:[%s1310_s17 + $0x4d0] sm:$0xff] %v549_v59  ;;  %806 = vst [vmem:[%s1310_s17 + $0x4d8] sm:$0xff] %v550_v60  ;;  %v555_v8 = vmax.bf16 %v1167_v3, %v299_v5  ;;  %v556_v9 = vmax.bf16 %v1167_v3, %v300_v6  ;;  %v301_v10 = vld [vmem:[%s1289_s30 + $0x510] sm:$0xff]  ;;  %v302_v11 = vld [vmem:[%s1289_s30 + $0x518] sm:$0xff] }
  0x89   : > { %v303_v12 = vld [vmem:[%s1289_s30 + $0x520] sm:$0xff]  ;;  %807 = vst [vmem:[%s1310_s17 + $0x4e0] sm:$0xff] %v551_v0  ;;  %808 = vst [vmem:[%s1310_s17 + $0x4e8] sm:$0xff] %v552_v1  ;;  %v557_v13 = vmax.bf16 %v1167_v3, %v301_v10  ;;  %v558_v14 = vmax.bf16 %v1167_v3, %v302_v11  ;;  %v304_v16 = vld [vmem:[%s1289_s30 + $0x528] sm:$0xff] }
  0x8a   : > { %809 = vst [vmem:[%s1310_s17 + $0x4f0] sm:$0xff] %v553_v2  ;;  %v559_v15 = vmax.bf16 %v1167_v3, %v303_v12  ;;  %v305_v17 = vld [vmem:[%s1289_s30 + $0x530] sm:$0xff]  ;;  %v306_v18 = vld [vmem:[%s1289_s30 + $0x538] sm:$0xff]  ;;  %810 = vst [vmem:[%s1310_s17 + $0x4f8] sm:$0xff] %v554_v7  ;;  %v560_v19 = vmax.bf16 %v1167_v3, %v304_v16 }
  0x8b   : > { %811 = vst [vmem:[%s1310_s17 + $0x500] sm:$0xff] %v555_v8  ;;  %812 = vst [vmem:[%s1310_s17 + $0x508] sm:$0xff] %v556_v9  ;;  %v561_v20 = vmax.bf16 %v1167_v3, %v305_v17  ;;  %v562_v21 = vmax.bf16 %v1167_v3, %v306_v18  ;;  %v307_v22 = vld [vmem:[%s1289_s30 + $0x540] sm:$0xff]  ;;  %v308_v23 = vld [vmem:[%s1289_s30 + $0x548] sm:$0xff] }
  0x8c   : > { %v309_v24 = vld [vmem:[%s1289_s30 + $0x550] sm:$0xff]  ;;  %813 = vst [vmem:[%s1310_s17 + $0x510] sm:$0xff] %v557_v13  ;;  %814 = vst [vmem:[%s1310_s17 + $0x518] sm:$0xff] %v558_v14  ;;  %v563_v25 = vmax.bf16 %v1167_v3, %v307_v22  ;;  %v564_v26 = vmax.bf16 %v1167_v3, %v308_v23  ;;  %v310_v28 = vld [vmem:[%s1289_s30 + $0x558] sm:$0xff] }
  0x8d   : > { %815 = vst [vmem:[%s1310_s17 + $0x520] sm:$0xff] %v559_v15  ;;  %v565_v27 = vmax.bf16 %v1167_v3, %v309_v24  ;;  %v311_v29 = vld [vmem:[%s1289_s30 + $0x560] sm:$0xff]  ;;  %v312_v30 = vld [vmem:[%s1289_s30 + $0x568] sm:$0xff]  ;;  %816 = vst [vmem:[%s1310_s17 + $0x528] sm:$0xff] %v560_v19  ;;  %v566_v31 = vmax.bf16 %v1167_v3, %v310_v28 }
  0x8e   : > { %817 = vst [vmem:[%s1310_s17 + $0x530] sm:$0xff] %v561_v20  ;;  %818 = vst [vmem:[%s1310_s17 + $0x538] sm:$0xff] %v562_v21  ;;  %v567_v32 = vmax.bf16 %v1167_v3, %v311_v29  ;;  %v568_v33 = vmax.bf16 %v1167_v3, %v312_v30  ;;  %v313_v34 = vld [vmem:[%s1289_s30 + $0x570] sm:$0xff]  ;;  %v314_v35 = vld [vmem:[%s1289_s30 + $0x578] sm:$0xff] }
  0x8f   : > { %v315_v36 = vld [vmem:[%s1289_s30 + $0x580] sm:$0xff]  ;;  %819 = vst [vmem:[%s1310_s17 + $0x540] sm:$0xff] %v563_v25  ;;  %820 = vst [vmem:[%s1310_s17 + $0x548] sm:$0xff] %v564_v26  ;;  %v569_v37 = vmax.bf16 %v1167_v3, %v313_v34  ;;  %v570_v38 = vmax.bf16 %v1167_v3, %v314_v35  ;;  %v316_v40 = vld [vmem:[%s1289_s30 + $0x588] sm:$0xff] }
  0x90   : > { %821 = vst [vmem:[%s1310_s17 + $0x550] sm:$0xff] %v565_v27  ;;  %v571_v39 = vmax.bf16 %v1167_v3, %v315_v36  ;;  %v317_v41 = vld [vmem:[%s1289_s30 + $0x590] sm:$0xff]  ;;  %v318_v42 = vld [vmem:[%s1289_s30 + $0x598] sm:$0xff]  ;;  %822 = vst [vmem:[%s1310_s17 + $0x558] sm:$0xff] %v566_v31  ;;  %v572_v43 = vmax.bf16 %v1167_v3, %v316_v40 }
  0x91   : > { %823 = vst [vmem:[%s1310_s17 + $0x560] sm:$0xff] %v567_v32  ;;  %824 = vst [vmem:[%s1310_s17 + $0x568] sm:$0xff] %v568_v33  ;;  %v573_v44 = vmax.bf16 %v1167_v3, %v317_v41  ;;  %v574_v45 = vmax.bf16 %v1167_v3, %v318_v42  ;;  %v319_v46 = vld [vmem:[%s1289_s30 + $0x5a0] sm:$0xff]  ;;  %v320_v47 = vld [vmem:[%s1289_s30 + $0x5a8] sm:$0xff] }
  0x92   : > { %v321_v48 = vld [vmem:[%s1289_s30 + $0x5b0] sm:$0xff]  ;;  %825 = vst [vmem:[%s1310_s17 + $0x570] sm:$0xff] %v569_v37  ;;  %826 = vst [vmem:[%s1310_s17 + $0x578] sm:$0xff] %v570_v38  ;;  %v575_v49 = vmax.bf16 %v1167_v3, %v319_v46  ;;  %v576_v50 = vmax.bf16 %v1167_v3, %v320_v47  ;;  %v322_v52 = vld [vmem:[%s1289_s30 + $0x5b8] sm:$0xff] }
  0x93   : > { %827 = vst [vmem:[%s1310_s17 + $0x580] sm:$0xff] %v571_v39  ;;  %v577_v51 = vmax.bf16 %v1167_v3, %v321_v48  ;;  %v323_v53 = vld [vmem:[%s1289_s30 + $0x5c0] sm:$0xff]  ;;  %v324_v54 = vld [vmem:[%s1289_s30 + $0x5c8] sm:$0xff]  ;;  %828 = vst [vmem:[%s1310_s17 + $0x588] sm:$0xff] %v572_v43  ;;  %v578_v55 = vmax.bf16 %v1167_v3, %v322_v52 }
  0x94   : > { %829 = vst [vmem:[%s1310_s17 + $0x590] sm:$0xff] %v573_v44  ;;  %830 = vst [vmem:[%s1310_s17 + $0x598] sm:$0xff] %v574_v45  ;;  %v579_v56 = vmax.bf16 %v1167_v3, %v323_v53  ;;  %v580_v57 = vmax.bf16 %v1167_v3, %v324_v54  ;;  %v325_v58 = vld [vmem:[%s1289_s30 + $0x5d0] sm:$0xff]  ;;  %v326_v59 = vld [vmem:[%s1289_s30 + $0x5d8] sm:$0xff] }
  0x95   : > { %v327_v60 = vld [vmem:[%s1289_s30 + $0x5e0] sm:$0xff]  ;;  %831 = vst [vmem:[%s1310_s17 + $0x5a0] sm:$0xff] %v575_v49  ;;  %832 = vst [vmem:[%s1310_s17 + $0x5a8] sm:$0xff] %v576_v50  ;;  %v581_v61 = vmax.bf16 %v1167_v3, %v325_v58  ;;  %v582_v62 = vmax.bf16 %v1167_v3, %v326_v59  ;;  %v328_v0 = vld [vmem:[%s1289_s30 + $0x5e8] sm:$0xff] }
  0x96   : > { %833 = vst [vmem:[%s1310_s17 + $0x5b0] sm:$0xff] %v577_v51  ;;  %v583_v63 = vmax.bf16 %v1167_v3, %v327_v60  ;;  %v329_v1 = vld [vmem:[%s1289_s30 + $0x5f0] sm:$0xff]  ;;  %v330_v2 = vld [vmem:[%s1289_s30 + $0x5f8] sm:$0xff]  ;;  %834 = vst [vmem:[%s1310_s17 + $0x5b8] sm:$0xff] %v578_v55  ;;  %v584_v4 = vmax.bf16 %v1167_v3, %v328_v0 }
  0x97   : > { %835 = vst [vmem:[%s1310_s17 + $0x5c0] sm:$0xff] %v579_v56  ;;  %836 = vst [vmem:[%s1310_s17 + $0x5c8] sm:$0xff] %v580_v57  ;;  %v585_v5 = vmax.bf16 %v1167_v3, %v329_v1  ;;  %v586_v6 = vmax.bf16 %v1167_v3, %v330_v2  ;;  %v331_v7 = vld [vmem:[%s1289_s30 + $0x600] sm:$0xff]  ;;  %v332_v8 = vld [vmem:[%s1289_s30 + $0x608] sm:$0xff] }
  0x98   : > { %v333_v9 = vld [vmem:[%s1289_s30 + $0x610] sm:$0xff]  ;;  %837 = vst [vmem:[%s1310_s17 + $0x5d0] sm:$0xff] %v581_v61  ;;  %838 = vst [vmem:[%s1310_s17 + $0x5d8] sm:$0xff] %v582_v62  ;;  %v587_v10 = vmax.bf16 %v1167_v3, %v331_v7  ;;  %v588_v11 = vmax.bf16 %v1167_v3, %v332_v8  ;;  %v334_v13 = vld [vmem:[%s1289_s30 + $0x618] sm:$0xff] }
  0x99   : > { %839 = vst [vmem:[%s1310_s17 + $0x5e0] sm:$0xff] %v583_v63  ;;  %v589_v12 = vmax.bf16 %v1167_v3, %v333_v9  ;;  %v335_v14 = vld [vmem:[%s1289_s30 + $0x620] sm:$0xff]  ;;  %v336_v15 = vld [vmem:[%s1289_s30 + $0x628] sm:$0xff]  ;;  %840 = vst [vmem:[%s1310_s17 + $0x5e8] sm:$0xff] %v584_v4  ;;  %v590_v16 = vmax.bf16 %v1167_v3, %v334_v13 }
  0x9a   : > { %841 = vst [vmem:[%s1310_s17 + $0x5f0] sm:$0xff] %v585_v5  ;;  %842 = vst [vmem:[%s1310_s17 + $0x5f8] sm:$0xff] %v586_v6  ;;  %v591_v17 = vmax.bf16 %v1167_v3, %v335_v14  ;;  %v592_v18 = vmax.bf16 %v1167_v3, %v336_v15  ;;  %v337_v19 = vld [vmem:[%s1289_s30 + $0x630] sm:$0xff]  ;;  %v338_v20 = vld [vmem:[%s1289_s30 + $0x638] sm:$0xff] }
  0x9b   : > { %v339_v21 = vld [vmem:[%s1289_s30 + $0x640] sm:$0xff]  ;;  %843 = vst [vmem:[%s1310_s17 + $0x600] sm:$0xff] %v587_v10  ;;  %844 = vst [vmem:[%s1310_s17 + $0x608] sm:$0xff] %v588_v11  ;;  %v593_v22 = vmax.bf16 %v1167_v3, %v337_v19  ;;  %v594_v23 = vmax.bf16 %v1167_v3, %v338_v20  ;;  %v340_v25 = vld [vmem:[%s1289_s30 + $0x648] sm:$0xff] }
  0x9c   : > { %845 = vst [vmem:[%s1310_s17 + $0x610] sm:$0xff] %v589_v12  ;;  %v595_v24 = vmax.bf16 %v1167_v3, %v339_v21  ;;  %v341_v26 = vld [vmem:[%s1289_s30 + $0x650] sm:$0xff]  ;;  %v342_v27 = vld [vmem:[%s1289_s30 + $0x658] sm:$0xff]  ;;  %846 = vst [vmem:[%s1310_s17 + $0x618] sm:$0xff] %v590_v16  ;;  %v596_v28 = vmax.bf16 %v1167_v3, %v340_v25 }
  0x9d   : > { %847 = vst [vmem:[%s1310_s17 + $0x620] sm:$0xff] %v591_v17  ;;  %848 = vst [vmem:[%s1310_s17 + $0x628] sm:$0xff] %v592_v18  ;;  %v597_v29 = vmax.bf16 %v1167_v3, %v341_v26  ;;  %v598_v30 = vmax.bf16 %v1167_v3, %v342_v27  ;;  %v343_v31 = vld [vmem:[%s1289_s30 + $0x660] sm:$0xff]  ;;  %v344_v32 = vld [vmem:[%s1289_s30 + $0x668] sm:$0xff] }
  0x9e   : > { %v345_v33 = vld [vmem:[%s1289_s30 + $0x670] sm:$0xff]  ;;  %849 = vst [vmem:[%s1310_s17 + $0x630] sm:$0xff] %v593_v22  ;;  %850 = vst [vmem:[%s1310_s17 + $0x638] sm:$0xff] %v594_v23  ;;  %v599_v34 = vmax.bf16 %v1167_v3, %v343_v31  ;;  %v600_v35 = vmax.bf16 %v1167_v3, %v344_v32  ;;  %v346_v37 = vld [vmem:[%s1289_s30 + $0x678] sm:$0xff] }
  0x9f   : > { %851 = vst [vmem:[%s1310_s17 + $0x640] sm:$0xff] %v595_v24  ;;  %v601_v36 = vmax.bf16 %v1167_v3, %v345_v33  ;;  %v347_v38 = vld [vmem:[%s1289_s30 + $0x680] sm:$0xff]  ;;  %v348_v39 = vld [vmem:[%s1289_s30 + $0x688] sm:$0xff]  ;;  %852 = vst [vmem:[%s1310_s17 + $0x648] sm:$0xff] %v596_v28  ;;  %v602_v40 = vmax.bf16 %v1167_v3, %v346_v37 }
  0xa0   : > { %853 = vst [vmem:[%s1310_s17 + $0x650] sm:$0xff] %v597_v29  ;;  %854 = vst [vmem:[%s1310_s17 + $0x658] sm:$0xff] %v598_v30  ;;  %v603_v41 = vmax.bf16 %v1167_v3, %v347_v38  ;;  %v604_v42 = vmax.bf16 %v1167_v3, %v348_v39  ;;  %v349_v43 = vld [vmem:[%s1289_s30 + $0x690] sm:$0xff]  ;;  %v350_v44 = vld [vmem:[%s1289_s30 + $0x698] sm:$0xff] }
  0xa1   : > { %v351_v45 = vld [vmem:[%s1289_s30 + $0x6a0] sm:$0xff]  ;;  %855 = vst [vmem:[%s1310_s17 + $0x660] sm:$0xff] %v599_v34  ;;  %856 = vst [vmem:[%s1310_s17 + $0x668] sm:$0xff] %v600_v35  ;;  %v605_v46 = vmax.bf16 %v1167_v3, %v349_v43  ;;  %v606_v47 = vmax.bf16 %v1167_v3, %v350_v44  ;;  %v352_v49 = vld [vmem:[%s1289_s30 + $0x6a8] sm:$0xff] }
  0xa2   : > { %857 = vst [vmem:[%s1310_s17 + $0x670] sm:$0xff] %v601_v36  ;;  %v607_v48 = vmax.bf16 %v1167_v3, %v351_v45  ;;  %v353_v50 = vld [vmem:[%s1289_s30 + $0x6b0] sm:$0xff]  ;;  %v354_v51 = vld [vmem:[%s1289_s30 + $0x6b8] sm:$0xff]  ;;  %858 = vst [vmem:[%s1310_s17 + $0x678] sm:$0xff] %v602_v40  ;;  %v608_v52 = vmax.bf16 %v1167_v3, %v352_v49 }
  0xa3   : > { %859 = vst [vmem:[%s1310_s17 + $0x680] sm:$0xff] %v603_v41  ;;  %860 = vst [vmem:[%s1310_s17 + $0x688] sm:$0xff] %v604_v42  ;;  %v609_v53 = vmax.bf16 %v1167_v3, %v353_v50  ;;  %v610_v54 = vmax.bf16 %v1167_v3, %v354_v51  ;;  %v355_v55 = vld [vmem:[%s1289_s30 + $0x6c0] sm:$0xff]  ;;  %v356_v56 = vld [vmem:[%s1289_s30 + $0x6c8] sm:$0xff] }
  0xa4   : > { %v357_v57 = vld [vmem:[%s1289_s30 + $0x6d0] sm:$0xff]  ;;  %861 = vst [vmem:[%s1310_s17 + $0x690] sm:$0xff] %v605_v46  ;;  %862 = vst [vmem:[%s1310_s17 + $0x698] sm:$0xff] %v606_v47  ;;  %v611_v58 = vmax.bf16 %v1167_v3, %v355_v55  ;;  %v612_v59 = vmax.bf16 %v1167_v3, %v356_v56  ;;  %v358_v61 = vld [vmem:[%s1289_s30 + $0x6d8] sm:$0xff] }
  0xa5   : > { %863 = vst [vmem:[%s1310_s17 + $0x6a0] sm:$0xff] %v607_v48  ;;  %v613_v60 = vmax.bf16 %v1167_v3, %v357_v57  ;;  %v359_v62 = vld [vmem:[%s1289_s30 + $0x6e0] sm:$0xff]  ;;  %v360_v63 = vld [vmem:[%s1289_s30 + $0x6e8] sm:$0xff]  ;;  %864 = vst [vmem:[%s1310_s17 + $0x6a8] sm:$0xff] %v608_v52  ;;  %v614_v0 = vmax.bf16 %v1167_v3, %v358_v61 }
  0xa6   : > { %865 = vst [vmem:[%s1310_s17 + $0x6b0] sm:$0xff] %v609_v53  ;;  %866 = vst [vmem:[%s1310_s17 + $0x6b8] sm:$0xff] %v610_v54  ;;  %v615_v1 = vmax.bf16 %v1167_v3, %v359_v62  ;;  %v616_v2 = vmax.bf16 %v1167_v3, %v360_v63  ;;  %v361_v4 = vld [vmem:[%s1289_s30 + $0x6f0] sm:$0xff]  ;;  %v362_v5 = vld [vmem:[%s1289_s30 + $0x6f8] sm:$0xff] }
  0xa7   : > { %v363_v6 = vld [vmem:[%s1289_s30 + $0x700] sm:$0xff]  ;;  %867 = vst [vmem:[%s1310_s17 + $0x6c0] sm:$0xff] %v611_v58  ;;  %868 = vst [vmem:[%s1310_s17 + $0x6c8] sm:$0xff] %v612_v59  ;;  %v617_v7 = vmax.bf16 %v1167_v3, %v361_v4  ;;  %v618_v8 = vmax.bf16 %v1167_v3, %v362_v5  ;;  %v364_v10 = vld [vmem:[%s1289_s30 + $0x708] sm:$0xff] }
  0xa8   : > { %869 = vst [vmem:[%s1310_s17 + $0x6d0] sm:$0xff] %v613_v60  ;;  %v619_v9 = vmax.bf16 %v1167_v3, %v363_v6  ;;  %v365_v11 = vld [vmem:[%s1289_s30 + $0x710] sm:$0xff]  ;;  %v366_v12 = vld [vmem:[%s1289_s30 + $0x718] sm:$0xff]  ;;  %870 = vst [vmem:[%s1310_s17 + $0x6d8] sm:$0xff] %v614_v0  ;;  %v620_v13 = vmax.bf16 %v1167_v3, %v364_v10 }
  0xa9   : > { %871 = vst [vmem:[%s1310_s17 + $0x6e0] sm:$0xff] %v615_v1  ;;  %872 = vst [vmem:[%s1310_s17 + $0x6e8] sm:$0xff] %v616_v2  ;;  %v621_v14 = vmax.bf16 %v1167_v3, %v365_v11  ;;  %v622_v15 = vmax.bf16 %v1167_v3, %v366_v12  ;;  %v367_v16 = vld [vmem:[%s1289_s30 + $0x720] sm:$0xff]  ;;  %v368_v17 = vld [vmem:[%s1289_s30 + $0x728] sm:$0xff] }
  0xaa   : > { %v369_v18 = vld [vmem:[%s1289_s30 + $0x730] sm:$0xff]  ;;  %873 = vst [vmem:[%s1310_s17 + $0x6f0] sm:$0xff] %v617_v7  ;;  %874 = vst [vmem:[%s1310_s17 + $0x6f8] sm:$0xff] %v618_v8  ;;  %v623_v19 = vmax.bf16 %v1167_v3, %v367_v16  ;;  %v624_v20 = vmax.bf16 %v1167_v3, %v368_v17  ;;  %v370_v22 = vld [vmem:[%s1289_s30 + $0x738] sm:$0xff] }
  0xab   : > { %875 = vst [vmem:[%s1310_s17 + $0x700] sm:$0xff] %v619_v9  ;;  %v625_v21 = vmax.bf16 %v1167_v3, %v369_v18  ;;  %v371_v23 = vld [vmem:[%s1289_s30 + $0x740] sm:$0xff]  ;;  %v372_v24 = vld [vmem:[%s1289_s30 + $0x748] sm:$0xff]  ;;  %876 = vst [vmem:[%s1310_s17 + $0x708] sm:$0xff] %v620_v13  ;;  %v626_v25 = vmax.bf16 %v1167_v3, %v370_v22 }
  0xac   : > { %877 = vst [vmem:[%s1310_s17 + $0x710] sm:$0xff] %v621_v14  ;;  %878 = vst [vmem:[%s1310_s17 + $0x718] sm:$0xff] %v622_v15  ;;  %v627_v26 = vmax.bf16 %v1167_v3, %v371_v23  ;;  %v628_v27 = vmax.bf16 %v1167_v3, %v372_v24  ;;  %v373_v28 = vld [vmem:[%s1289_s30 + $0x750] sm:$0xff]  ;;  %v374_v29 = vld [vmem:[%s1289_s30 + $0x758] sm:$0xff] }
  0xad   : > { %v375_v30 = vld [vmem:[%s1289_s30 + $0x760] sm:$0xff]  ;;  %879 = vst [vmem:[%s1310_s17 + $0x720] sm:$0xff] %v623_v19  ;;  %880 = vst [vmem:[%s1310_s17 + $0x728] sm:$0xff] %v624_v20  ;;  %v629_v31 = vmax.bf16 %v1167_v3, %v373_v28  ;;  %v630_v32 = vmax.bf16 %v1167_v3, %v374_v29  ;;  %v376_v34 = vld [vmem:[%s1289_s30 + $0x768] sm:$0xff] }
  0xae   : > { %881 = vst [vmem:[%s1310_s17 + $0x730] sm:$0xff] %v625_v21  ;;  %v631_v33 = vmax.bf16 %v1167_v3, %v375_v30  ;;  %v377_v35 = vld [vmem:[%s1289_s30 + $0x770] sm:$0xff]  ;;  %v378_v36 = vld [vmem:[%s1289_s30 + $0x778] sm:$0xff]  ;;  %882 = vst [vmem:[%s1310_s17 + $0x738] sm:$0xff] %v626_v25  ;;  %v632_v37 = vmax.bf16 %v1167_v3, %v376_v34 }
  0xaf   : > { %883 = vst [vmem:[%s1310_s17 + $0x740] sm:$0xff] %v627_v26  ;;  %884 = vst [vmem:[%s1310_s17 + $0x748] sm:$0xff] %v628_v27  ;;  %v633_v38 = vmax.bf16 %v1167_v3, %v377_v35  ;;  %v634_v39 = vmax.bf16 %v1167_v3, %v378_v36  ;;  %v379_v40 = vld [vmem:[%s1289_s30 + $0x780] sm:$0xff]  ;;  %v380_v41 = vld [vmem:[%s1289_s30 + $0x788] sm:$0xff] }
  0xb0   : > { %v381_v42 = vld [vmem:[%s1289_s30 + $0x790] sm:$0xff]  ;;  %885 = vst [vmem:[%s1310_s17 + $0x750] sm:$0xff] %v629_v31  ;;  %886 = vst [vmem:[%s1310_s17 + $0x758] sm:$0xff] %v630_v32  ;;  %v635_v43 = vmax.bf16 %v1167_v3, %v379_v40  ;;  %v636_v44 = vmax.bf16 %v1167_v3, %v380_v41  ;;  %v382_v46 = vld [vmem:[%s1289_s30 + $0x798] sm:$0xff] }
  0xb1   : > { %887 = vst [vmem:[%s1310_s17 + $0x760] sm:$0xff] %v631_v33  ;;  %v637_v45 = vmax.bf16 %v1167_v3, %v381_v42  ;;  %v383_v47 = vld [vmem:[%s1289_s30 + $0x7a0] sm:$0xff]  ;;  %v384_v48 = vld [vmem:[%s1289_s30 + $0x7a8] sm:$0xff]  ;;  %888 = vst [vmem:[%s1310_s17 + $0x768] sm:$0xff] %v632_v37  ;;  %v638_v49 = vmax.bf16 %v1167_v3, %v382_v46 }
  0xb2   : > { %889 = vst [vmem:[%s1310_s17 + $0x770] sm:$0xff] %v633_v38  ;;  %890 = vst [vmem:[%s1310_s17 + $0x778] sm:$0xff] %v634_v39  ;;  %v639_v50 = vmax.bf16 %v1167_v3, %v383_v47  ;;  %v640_v51 = vmax.bf16 %v1167_v3, %v384_v48  ;;  %v385_v52 = vld [vmem:[%s1289_s30 + $0x7b0] sm:$0xff]  ;;  %v386_v53 = vld [vmem:[%s1289_s30 + $0x7b8] sm:$0xff] }
  0xb3   : > { %v387_v54 = vld [vmem:[%s1289_s30 + $0x7c0] sm:$0xff]  ;;  %891 = vst [vmem:[%s1310_s17 + $0x780] sm:$0xff] %v635_v43  ;;  %892 = vst [vmem:[%s1310_s17 + $0x788] sm:$0xff] %v636_v44  ;;  %v641_v55 = vmax.bf16 %v1167_v3, %v385_v52  ;;  %v642_v56 = vmax.bf16 %v1167_v3, %v386_v53  ;;  %v388_v58 = vld [vmem:[%s1289_s30 + $0x7c8] sm:$0xff] }
  0xb4   : > { %893 = vst [vmem:[%s1310_s17 + $0x790] sm:$0xff] %v637_v45  ;;  %v643_v57 = vmax.bf16 %v1167_v3, %v387_v54  ;;  %v389_v59 = vld [vmem:[%s1289_s30 + $0x7d0] sm:$0xff]  ;;  %v390_v60 = vld [vmem:[%s1289_s30 + $0x7d8] sm:$0xff]  ;;  %894 = vst [vmem:[%s1310_s17 + $0x798] sm:$0xff] %v638_v49  ;;  %v644_v61 = vmax.bf16 %v1167_v3, %v388_v58 }
  0xb5   : > { %895 = vst [vmem:[%s1310_s17 + $0x7a0] sm:$0xff] %v639_v50  ;;  %896 = vst [vmem:[%s1310_s17 + $0x7a8] sm:$0xff] %v640_v51  ;;  %v645_v62 = vmax.bf16 %v1167_v3, %v389_v59  ;;  %v646_v63 = vmax.bf16 %v1167_v3, %v390_v60  ;;  %v391_v0 = vld [vmem:[%s1289_s30 + $0x7e0] sm:$0xff]  ;;  %v392_v1 = vld [vmem:[%s1289_s30 + $0x7e8] sm:$0xff] }
  0xb6   : > { %v393_v2 = vld [vmem:[%s1289_s30 + $0x7f0] sm:$0xff]  ;;  %897 = vst [vmem:[%s1310_s17 + $0x7b0] sm:$0xff] %v641_v55  ;;  %898 = vst [vmem:[%s1310_s17 + $0x7b8] sm:$0xff] %v642_v56  ;;  %v647_v4 = vmax.bf16 %v1167_v3, %v391_v0  ;;  %v648_v5 = vmax.bf16 %v1167_v3, %v392_v1  ;;  %v394_v7 = vld [vmem:[%s1289_s30 + $0x7f8] sm:$0xff] }
  0xb7   : > { %899 = vst [vmem:[%s1310_s17 + $0x7c0] sm:$0xff] %v643_v57  ;;  %v649_v6 = vmax.bf16 %v1167_v3, %v393_v2  ;;  %900 = vst [vmem:[%s1310_s17 + $0x7c8] sm:$0xff] %v644_v61  ;;  %v650_v8 = vmax.bf16 %v1167_v3, %v394_v7 }
  0xb8   : > { %901 = vst [vmem:[%s1310_s17 + $0x7d0] sm:$0xff] %v645_v62  ;;  %902 = vst [vmem:[%s1310_s17 + $0x7d8] sm:$0xff] %v646_v63 }
  0xb9   : > { %903 = vst [vmem:[%s1310_s17 + $0x7e0] sm:$0xff] %v647_v4  ;;  %904 = vst [vmem:[%s1310_s17 + $0x7e8] sm:$0xff] %v648_v5 }
  0xba   : > { %905 = vst [vmem:[%s1310_s17 + $0x7f0] sm:$0xff] %v649_v6  ;;  %906 = vst [vmem:[%s1310_s17 + $0x7f8] sm:$0xff] %v650_v8 }
  0xbb   : > { %1109 = shalt.err (!%p1106_p2)
}
  0xbc   : > { %s1110_s13 = scalar_lea.hbm %s2062_s29, 32768  ;;  %s1114_s20 = scalar_lea.hbm %s2117_s1, 65536 }
  0xbd   : > { %p1111_p4 = scmp.ne.s32.totalorder %s2062_s29, %s1110_s13  ;;  %p1115_p9 = scmp.lt.u32.totalorder %s2062_s29, %s2117_s1 }
  0xbe   : > { %p1116_p1 = scmp.lt.u32.totalorder %s1114_s20, %s1110_s13  ;;  %p1118_p6 = scmp.lt.u32.totalorder %s1110_s13, %s2062_s29 }
  0xbf   : > { %p1112_p5 = pnand %p1111_p4, %p2124_p11 }
  0xc0   : > { %p1117_p3 = por %p1116_p1, %p1115_p9 }
  0xc1   : > { %p1113_p7 = pneg %p1112_p5 }
  0xc2   : > { %p1119_p12 = por %p1118_p6, %p1117_p3 }
  0xc4   : > { %p1120_p13 = pnand %p1119_p12, %p1113_p7 }
  0xc6   : > { %1123 = shalt.err (!%p1120_p13)
}
  0xc7   : > { %s1169_s24 = smov 2048   ;;  %s1170_s26 = smov 128  }
  0xc8   : > { %1017 = dma.vmem_to_hbm [thread:$0]  (%p2124_p11), %s2064_s27, 32768, %s2062_s29, %s908_s2, %s1169_s24, %s1169_s24, %s1170_s26  }
  0xc9 PF: > { %s937_s30 = sand.u32 1, %s1150_s6   ;;  %p2125_p8 = scmp.ne.s32.totalorder %s2122_s19, 0 }
  0xca   : > { %p2126_p10 = scmp.ge.s32.totalorder %s1162_s9, 2  ;;  %s938_s17 = scalar_lea.sflag [#allocation4], %s937_s30 }
  0xcc   : > { %p1024_p0 = pnand %p2126_p10, %p2125_p8 }
  0xce   : > { %1145 = dma.done.wait (!%p1024_p0), %s938_s17, 32768  }
  0xcf   : > { %1147 = vsyncadd (!%p1024_p0), %s938_s17, 4294934528  ;;  %p14_p2 = scmp.ge.s32.totalorder %s1206_s12, 4   ;;  %s2127_s6 = smov %s1154_s7 }
  0xd0   : > { %s2128_s7 = smov %s1158_s8  ;;  %s2129_s8 = smov %s1218_s15 }
  0xd1   : > { %s2130_s9 = smov %s1206_s12  ;;  %16 = sbr.rel (!%p14_p2) target bundleno = 5 (0x5), region = 69 }
  0xd8   :  { %943 = vsyncpa [#allocation3], 1 }
  0xd9   :  { %945 = vsyncpa [#allocation3 + $0x1], 1 }
  0xda   :  { %946 = vsyncpa [#allocation4], 1 }
  0xdb   :  { %948 = vsyncpa [#allocation4 + $0x1], 1 }

</bundles_post_ra>
